<compile_context>
chip_gen: v5e
topology: v5e:2x2
jax: 0.10.0
libtpu: 0.0.40
codegen_flags: <defaults>
</compile_context>

<pallas_src>
import functools

import jax
import jax.numpy as jnp
from jax.experimental import pallas as pl
from jax.experimental.pallas import tpu as pltpu


def _tvl1_kernel(dec_ref, gt_ref, out_ref, carry_ref, l1_acc, tv_acc,
                 *, W, HW, TC, H):
    """Grid = (batch ["parallel"], channel-tile ["arbitrary"]).

    dec_ref/gt_ref: (1, TC, HW) lane-dense slabs.
    out_ref: (1, 2, 128) per-batch output block (row 0 = L1, row 1 = TV),
             written only at the last channel tile.
    carry_ref: last channel plane of the previous tile (cross-tile TV halo).
    l1_acc / tv_acc: (1, HW) per-lane partial accumulators (cross-lane reduce
             deferred to the last channel tile).
    """
    k = pl.program_id(1)  # channel-tile index (innermost, sequential axis)

    @pl.when(k == 0)
    def _init():
        l1_acc[...] = jnp.zeros_like(l1_acc)
        tv_acc[...] = jnp.zeros_like(tv_acc)

    d = dec_ref[...].astype(jnp.float32)   # (1, TC, HW)
    g = gt_ref[...].astype(jnp.float32)    # (1, TC, HW)
    # TODO(synk): on v6e/v7x with bf16 inputs, keep sub/abs in bf16 and upcast
    # only when adding into the f32 partials (v5e has no bf16 VPU).

    # ---- per-lane partials: reduce only the channel/sublane axis here ------
    l1_p = jnp.sum(jnp.abs(d - g), axis=1)              # (1, HW)
    tv_p = jnp.zeros((1, HW), jnp.float32)

    # Channel-direction TV inside this tile (cheap second-minor-dim slices).
    if TC > 1:
        tv_p = tv_p + jnp.sum(jnp.abs(d[:, 1:, :] - d[:, :-1, :]), axis=1)

    # Row-direction TV: (h+1, w) - (h, w) == lane offset of W in the folded
    # H*W axis.  Single XLU roll (rolled[p] = d[p + W]) + mask of the wrapped
    # last W lanes, applied after the channel-sum so the select is only (1,HW).
    if H > 1:
        if HW % 128 == 0:
            rolled = pltpu.roll(d, shift=HW - W, axis=2)
            row = jnp.sum(jnp.abs(rolled - d), axis=1)           # (1, HW)
            lane = jax.lax.broadcasted_iota(jnp.int32, (1, HW), 1)
            tv_p = tv_p + jnp.where(lane < HW - W, row, 0.0)
        else:
            # Fallback for non-128-aligned spatial planes: scalar sum of the
            # sliced diffs, injected into lane 0 (final reduce sums all lanes).
            row_scalar = jnp.sum(jnp.abs(d[:, :, W:] - d[:, :, :HW - W]))
            lane = jax.lax.broadcasted_iota(jnp.int32, (1, HW), 1)
            tv_p = tv_p + jnp.where(lane == 0, row_scalar, 0.0)

    # Cross-tile channel boundary diff: |d[k*TC] - d[k*TC - 1]|.
    @pl.when(k > 0)
    def _boundary():
        tv_acc[...] += jnp.abs(d[:, 0, :] - carry_ref[...])

    l1_acc[...] += l1_p
    tv_acc[...] += tv_p

    # Carry the last channel plane of this tile for the next tile.
    carry_ref[...] = d[:, TC - 1, :]

    # ---- finalize once per batch: cross-lane reduce + single output store --
    @pl.when(k == pl.num_programs(1) - 1)
    def _finalize():
        l1_total = jnp.sum(l1_acc[...])
        tv_total = jnp.sum(tv_acc[...])
        row_id = jax.lax.broadcasted_iota(jnp.int32, (1, 2, 128), 1)
        out_ref[...] = jnp.where(row_id == 0, l1_total, tv_total).astype(
            jnp.float32)


def _vmem_capacity_bytes():
    """Physical VMEM of the local chip; conservative (v7x) fallback."""
    try:
        info = pltpu.get_tpu_info()
        for attr in ("vmem_capacity_bytes", "vmem_bytes", "vmem_size_bytes"):
            cap = getattr(info, attr, None)
            if cap:
                return int(cap)
    except Exception:
        pass
    return 64 << 20


def _pick_channel_tile(C, HW, itemsize, target_bytes):
    """Largest legal channel tile whose (1, TC, HW) block fits target_bytes.

    Layout rule: the second-to-last block dim must be a multiple of 8 or equal
    the full channel extent C, so candidates are C itself or multiples of 8
    that divide C.
    """
    if C * HW * itemsize <= target_bytes:
        return C                           # single tile: best case
    cands = [tc for tc in range(8, C + 1, 8)
             if C % tc == 0 and tc * HW * itemsize <= target_bytes]
    if cands:
        return max(cands)
    # TODO(synk): very large H*W (single channel plane above the VMEM budget)
    # would additionally need tiling of the folded lane axis (with a W halo).
    return C


def tvl1_loss(decoded, gt, beta=1.0):
    assert decoded.shape == gt.shape and decoded.ndim == 4, "expects NCHW inputs"
    N, C, H, W = decoded.shape
    HW = H * W

    # Lane-dense layout: fold (H, W) onto the lane axis (free reshape in HBM).
    dec3 = decoded.reshape(N, C, HW)
    gt3 = gt.reshape(N, C, HW)

    # Generation-specific VMEM budgeting (128 MiB on v5e/v6e, 64 MiB on v7x).
    vmem_cap = _vmem_capacity_bytes()
    if vmem_cap >= (96 << 20):
        target_block_bytes = 12 << 20      # 2 inputs x 2 bufs x 12 MiB ~ 48 MiB
        vmem_limit = 96 << 20
    else:
        target_block_bytes = 5 << 20       # 2 x 2 x 5 MiB ~ 20 MiB
        vmem_limit = 48 << 20              # leave headroom on v7x's 64 MiB

    itemsize = jnp.dtype(dec3.dtype).itemsize
    TC = _pick_channel_tile(C, HW, itemsize, target_block_bytes)
    KC = C // TC

    kernel = functools.partial(_tvl1_kernel, W=W, HW=HW, TC=TC, H=H)

    parts = pl.pallas_call(
        kernel,
        out_shape=jax.ShapeDtypeStruct((N, 2, 128), jnp.float32),
        grid_spec=pltpu.PrefetchScalarGridSpec(
            num_scalar_prefetch=0,
            grid=(N, KC),
            in_specs=[
                pl.BlockSpec((1, TC, HW), lambda i, k: (i, k, 0)),
                pl.BlockSpec((1, TC, HW), lambda i, k: (i, k, 0)),
            ],
            out_specs=pl.BlockSpec((1, 2, 128), lambda i, k: (i, 0, 0)),
            scratch_shapes=[
                pltpu.VMEM((1, HW), jnp.float32),   # channel-halo carry
                pltpu.VMEM((1, HW), jnp.float32),   # per-lane L1 partials
                pltpu.VMEM((1, HW), jnp.float32),   # per-lane TV partials
            ],
        ),
        compiler_params=pltpu.CompilerParams(
            dimension_semantics=("parallel", "arbitrary"),
            vmem_limit_bytes=vmem_limit,
        ),
    )(dec3, gt3)

    l1_total = jnp.sum(parts[:, 0, 0])           # global L1 sum (scalar)
    tv_per_n = parts[:, 1, 0]                    # per-batch total variation
    return l1_total + jnp.asarray(beta, jnp.float32) * tv_per_n   # shape (N,)


def _reference(decoded, gt, beta=1.0):
    l1 = jnp.sum(jnp.abs(decoded - gt))
    tv = (jnp.sum(jnp.abs(decoded[:, 1:] - decoded[:, :-1]), axis=(1, 2, 3))
          + jnp.sum(jnp.abs(decoded[:, :, 1:, :] - decoded[:, :, :-1, :]),
                    axis=(1, 2, 3)))
    return l1 + beta * tv


if __name__ == "__main__":
    key = jax.random.PRNGKey(0)
    k1, k2 = jax.random.split(key)
    decoded = jax.random.normal(k1, (2, 4, 16, 16), dtype=jnp.float32)
    gt = jax.random.normal(k2, (2, 4, 16, 16), dtype=jnp.float32)

    out = tvl1_loss(decoded, gt, beta=1.0)
    out = jax.block_until_ready(out)

    ref = _reference(decoded, gt, beta=1.0)
    assert out.shape == (decoded.shape[0],), out.shape
    assert jnp.allclose(out, ref, rtol=1e-5, atol=1e-4), (out, ref)

    print("KERNEL_OK")
</pallas_src>

<mosaic_0001>
module attributes {stable_mosaic.version = 11 : i64} {
  func.func @_tvl1_kernel(%arg0: i32, %arg1: i32, %arg2: memref<1x4x256xf32, #tpu.memory_space<vmem>>, %arg3: memref<1x4x256xf32, #tpu.memory_space<vmem>>, %arg4: memref<1x2x128xf32, #tpu.memory_space<vmem>>, %arg5: memref<1x256xf32, #tpu.memory_space<vmem>>, %arg6: memref<1x256xf32, #tpu.memory_space<vmem>>, %arg7: memref<1x256xf32, #tpu.memory_space<vmem>>) attributes {dimension_semantics = [#tpu.dimension_semantics<parallel>, #tpu.dimension_semantics<arbitrary>], iteration_bounds = array<i64: 2, 1>, scalar_prefetch = 0 : i64, scratch_operands = 3 : i64, tpu.core_type = #tpu.core_type<tc>, window_params = [{transform_indices = @transform_0, window_bounds = array<i64: 1, 4, 256>}, {transform_indices = @transform_1, window_bounds = array<i64: 1, 4, 256>}, {transform_indices = @transform_2, window_bounds = array<i64: 1, 2, 128>}]} {
    %c0_i32 = arith.constant 0 : i32
    %0 = arith.cmpi eq, %arg1, %c0_i32 : i32
    %1 = arith.extui %0 : i1 to i32
    %c0_i32_0 = arith.constant 0 : i32
    %2 = arith.cmpi ne, %1, %c0_i32_0 : i32
    scf.if %2 {
      %cst_25 = arith.constant 0.000000e+00 : f32
      %40 = vector.broadcast %cst_25 : f32 to vector<1x256xf32>
      %c0_26 = arith.constant 0 : index
      %c0_27 = arith.constant 0 : index
      %41 = vector.load %arg6[%c0_26, %c0_27] : memref<1x256xf32, #tpu.memory_space<vmem>>, vector<1x256xf32>
      tpu.vector_store %arg6[%c0_26, %c0_27], %40 {strides = array<i32>} : memref<1x256xf32, #tpu.memory_space<vmem>>, vector<1x256xf32>,
      %cst_28 = arith.constant 0.000000e+00 : f32
      %42 = vector.broadcast %cst_28 : f32 to vector<1x256xf32>
      %c0_29 = arith.constant 0 : index
      %c0_30 = arith.constant 0 : index
      %43 = vector.load %arg7[%c0_29, %c0_30] : memref<1x256xf32, #tpu.memory_space<vmem>>, vector<1x256xf32>
      tpu.vector_store %arg7[%c0_29, %c0_30], %42 {strides = array<i32>} : memref<1x256xf32, #tpu.memory_space<vmem>>, vector<1x256xf32>,
    } else {
    }
    %c0 = arith.constant 0 : index
    %c0_1 = arith.constant 0 : index
    %c0_2 = arith.constant 0 : index
    %3 = vector.load %arg2[%c0, %c0_1, %c0_2] : memref<1x4x256xf32, #tpu.memory_space<vmem>>, vector<1x4x256xf32>
    %c0_3 = arith.constant 0 : index
    %c0_4 = arith.constant 0 : index
    %c0_5 = arith.constant 0 : index
    %4 = vector.load %arg3[%c0_3, %c0_4, %c0_5] : memref<1x4x256xf32, #tpu.memory_space<vmem>>, vector<1x4x256xf32>
    %5 = arith.subf %3, %4 : vector<1x4x256xf32>
    %6 = math.absf %5 : vector<1x4x256xf32>
    %cst = arith.constant dense<0.000000e+00> : vector<1x256xf32>
    %7 = vector.multi_reduction <add>, %6, %cst [1] : vector<1x4x256xf32> to vector<1x256xf32>
    %cst_6 = arith.constant 0.000000e+00 : f32
    %8 = vector.broadcast %cst_6 : f32 to vector<1x256xf32>
    %9 = vector.extract_strided_slice %3 {offsets = [0, 1, 0], sizes = [1, 3, 256], strides = [1, 1, 1]} : vector<1x4x256xf32> to vector<1x3x256xf32>
    %10 = vector.extract_strided_slice %3 {offsets = [0, 0, 0], sizes = [1, 3, 256], strides = [1, 1, 1]} : vector<1x4x256xf32> to vector<1x3x256xf32>
    %11 = arith.subf %9, %10 : vector<1x3x256xf32>
    %12 = math.absf %11 : vector<1x3x256xf32>
    %cst_7 = arith.constant dense<0.000000e+00> : vector<1x256xf32>
    %13 = vector.multi_reduction <add>, %12, %cst_7 [1] : vector<1x3x256xf32> to vector<1x256xf32>
    %14 = arith.addf %8, %13 : vector<1x256xf32>
    %c240_i32 = arith.constant 240 : i32
    %15 = tpu.dynamic_rotate %3 by %c240_i32 dim 2 : vector<1x4x256xf32>, i32 -> vector<1x4x256xf32>
    %16 = arith.subf %15, %3 : vector<1x4x256xf32>
    %17 = math.absf %16 : vector<1x4x256xf32>
    %cst_8 = arith.constant dense<0.000000e+00> : vector<1x256xf32>
    %18 = vector.multi_reduction <add>, %17, %cst_8 [1] : vector<1x4x256xf32> to vector<1x256xf32>
    %19 = tpu.iota {dimensions = array<i32: 1>} : vector<1x256xi32>
    %c240_i32_9 = arith.constant 240 : i32
    %20 = vector.broadcast %c240_i32_9 : i32 to vector<1x256xi32>
    %21 = arith.cmpi slt, %19, %20 : vector<1x256xi32>
    %cst_10 = arith.constant 0.000000e+00 : f32
    %22 = vector.broadcast %cst_10 : f32 to vector<1x256xf32>
    %23 = arith.select %21, %18, %22 : vector<1x256xi1>, vector<1x256xf32>
    %24 = arith.addf %14, %23 : vector<1x256xf32>
    %c0_i32_11 = arith.constant 0 : i32
    %25 = arith.cmpi sgt, %arg1, %c0_i32_11 : i32
    %26 = arith.extui %25 : i1 to i32
    %c0_i32_12 = arith.constant 0 : i32
    %27 = arith.cmpi ne, %26, %c0_i32_12 : i32
    scf.if %27 {
      %c0_25 = arith.constant 0 : index
      %c0_26 = arith.constant 0 : index
      %40 = vector.load %arg7[%c0_25, %c0_26] : memref<1x256xf32, #tpu.memory_space<vmem>>, vector<1x256xf32>
      %41 = vector.extract_strided_slice %3 {offsets = [0, 0, 0], sizes = [1, 1, 256], strides = [1, 1, 1]} : vector<1x4x256xf32> to vector<1x1x256xf32>
      %42 = vector.shape_cast %41 : vector<1x1x256xf32> to vector<1x256xf32>
      %c0_27 = arith.constant 0 : index
      %c0_28 = arith.constant 0 : index
      %43 = vector.load %arg5[%c0_27, %c0_28] : memref<1x256xf32, #tpu.memory_space<vmem>>, vector<1x256xf32>
      %44 = arith.subf %42, %43 : vector<1x256xf32>
      %45 = math.absf %44 : vector<1x256xf32>
      %46 = arith.addf %40, %45 : vector<1x256xf32>
      %c0_29 = arith.constant 0 : index
      %c0_30 = arith.constant 0 : index
      %47 = vector.load %arg7[%c0_29, %c0_30] : memref<1x256xf32, #tpu.memory_space<vmem>>, vector<1x256xf32>
      tpu.vector_store %arg7[%c0_29, %c0_30], %46 {strides = array<i32>} : memref<1x256xf32, #tpu.memory_space<vmem>>, vector<1x256xf32>,
    } else {
    }
    %c0_13 = arith.constant 0 : index
    %c0_14 = arith.constant 0 : index
    %28 = vector.load %arg6[%c0_13, %c0_14] : memref<1x256xf32, #tpu.memory_space<vmem>>, vector<1x256xf32>
    %29 = arith.addf %28, %7 : vector<1x256xf32>
    %c0_15 = arith.constant 0 : index
    %c0_16 = arith.constant 0 : index
    %30 = vector.load %arg6[%c0_15, %c0_16] : memref<1x256xf32, #tpu.memory_space<vmem>>, vector<1x256xf32>
    tpu.vector_store %arg6[%c0_15, %c0_16], %29 {strides = array<i32>} : memref<1x256xf32, #tpu.memory_space<vmem>>, vector<1x256xf32>,
    %c0_17 = arith.constant 0 : index
    %c0_18 = arith.constant 0 : index
    %31 = vector.load %arg7[%c0_17, %c0_18] : memref<1x256xf32, #tpu.memory_space<vmem>>, vector<1x256xf32>
    %32 = arith.addf %31, %24 : vector<1x256xf32>
    %c0_19 = arith.constant 0 : index
    %c0_20 = arith.constant 0 : index
    %33 = vector.load %arg7[%c0_19, %c0_20] : memref<1x256xf32, #tpu.memory_space<vmem>>, vector<1x256xf32>
    tpu.vector_store %arg7[%c0_19, %c0_20], %32 {strides = array<i32>} : memref<1x256xf32, #tpu.memory_space<vmem>>, vector<1x256xf32>,
    %34 = vector.extract_strided_slice %3 {offsets = [0, 3, 0], sizes = [1, 1, 256], strides = [1, 1, 1]} : vector<1x4x256xf32> to vector<1x1x256xf32>
    %35 = vector.shape_cast %34 : vector<1x1x256xf32> to vector<1x256xf32>
    %c0_21 = arith.constant 0 : index
    %c0_22 = arith.constant 0 : index
    %36 = vector.load %arg5[%c0_21, %c0_22] : memref<1x256xf32, #tpu.memory_space<vmem>>, vector<1x256xf32>
    tpu.vector_store %arg5[%c0_21, %c0_22], %35 {strides = array<i32>} : memref<1x256xf32, #tpu.memory_space<vmem>>, vector<1x256xf32>,
    %c0_i32_23 = arith.constant 0 : i32
    %37 = arith.cmpi eq, %arg1, %c0_i32_23 : i32
    %38 = arith.extui %37 : i1 to i32
    %c0_i32_24 = arith.constant 0 : i32
    %39 = arith.cmpi ne, %38, %c0_i32_24 : i32
    scf.if %39 {
      %c0_25 = arith.constant 0 : index
      %c0_26 = arith.constant 0 : index
      %40 = vector.load %arg6[%c0_25, %c0_26] : memref<1x256xf32, #tpu.memory_space<vmem>>, vector<1x256xf32>
      %41 = vector.shape_cast %40 : vector<1x256xf32> to vector<1x1x256xf32>
      %cst_27 = arith.constant dense<0.000000e+00> : vector<1xf32>
      %42 = vector.multi_reduction <add>, %41, %cst_27 [1, 2] : vector<1x1x256xf32> to vector<1xf32>
      %43 = vector.shape_cast %42 : vector<1xf32> to vector<1x1x1xf32>
      %44 = vector.extract %43[0, 0, 0] : f32 from vector<1x1x1xf32>
      %c0_28 = arith.constant 0 : index
      %c0_29 = arith.constant 0 : index
      %45 = vector.load %arg7[%c0_28, %c0_29] : memref<1x256xf32, #tpu.memory_space<vmem>>, vector<1x256xf32>
      %46 = vector.shape_cast %45 : vector<1x256xf32> to vector<1x1x256xf32>
      %cst_30 = arith.constant dense<0.000000e+00> : vector<1xf32>
      %47 = vector.multi_reduction <add>, %46, %cst_30 [1, 2] : vector<1x1x256xf32> to vector<1xf32>
      %48 = vector.shape_cast %47 : vector<1xf32> to vector<1x1x1xf32>
      %49 = vector.extract %48[0, 0, 0] : f32 from vector<1x1x1xf32>
      %50 = tpu.iota {dimensions = array<i32: 1>} : vector<1x2x128xi32>
      %c0_i32_31 = arith.constant 0 : i32
      %51 = vector.broadcast %c0_i32_31 : i32 to vector<1x2x128xi32>
      %52 = arith.cmpi eq, %50, %51 : vector<1x2x128xi32>
      %53 = vector.broadcast %44 : f32 to vector<1x2x128xf32>
      %54 = vector.broadcast %49 : f32 to vector<1x2x128xf32>
      %55 = arith.select %52, %53, %54 : vector<1x2x128xi1>, vector<1x2x128xf32>
      %c0_32 = arith.constant 0 : index
      %c0_33 = arith.constant 0 : index
      %c0_34 = arith.constant 0 : index
      %56 = vector.load %arg4[%c0_32, %c0_33, %c0_34] : memref<1x2x128xf32, #tpu.memory_space<vmem>>, vector<1x2x128xf32>
      tpu.vector_store %arg4[%c0_32, %c0_33, %c0_34], %55 {strides = array<i32>} : memref<1x2x128xf32, #tpu.memory_space<vmem>>, vector<1x2x128xf32>,
    } else {
    }
    return
  }
  func.func @transform_0(%arg0: i32, %arg1: i32) -> (i32, i32, i32) {
    %c0_i32 = arith.constant 0 : i32
    %c0_i32_0 = arith.constant 0 : i32
    return %arg0, %arg1, %c0_i32 : i32, i32, i32
  }
  func.func @transform_1(%arg0: i32, %arg1: i32) -> (i32, i32, i32) {
    %c0_i32 = arith.constant 0 : i32
    %c0_i32_0 = arith.constant 0 : i32
    return %arg0, %arg1, %c0_i32 : i32, i32, i32
  }
  func.func @transform_2(%arg0: i32, %arg1: i32) -> (i32, i32, i32) {
    %c0_i32 = arith.constant 0 : i32
    %c0_i32_0 = arith.constant 0 : i32
    %c0_i32_1 = arith.constant 0 : i32
    return %arg0, %c0_i32, %c0_i32_0 : i32, i32, i32
  }
}

</mosaic_0001>

<bundles_post_ra>
// kernel: tpu_custom_call.1
= control target key start
LH: loop header
LB: loop body
LE: loop exit
PB: predicated region body
PF: predicated region fallthrough
CT: control target
= control target key end

     0   :  { %7 = vsyncpa [#allocation6], 0  ;;  %s963_s0 = inlined_call_operand.hbm [shape: f32[2,4,256], index: 0, kind: input, shape index: {}]   ;;  %s964_s1 = inlined_call_operand.hbm [shape: f32[2,4,256], index: 1, kind: input, shape index: {}]   ;;  %s965_s2 = inlined_call_operand.hbm [shape: f32[2,2,128], index: 2, kind: output, shape index: {}]  }
   0x1   :  { %9 = vsyncpa [#allocation6 + $0x1], 0 }
   0x2   :  { %10 = vsyncpa [#allocation9], 0 }
   0x3   :  { %12 = vsyncpa [#allocation9 + $0x1], 0 }
   0x4   :  { %13 = vsyncpa [#allocation7], 0 }
   0x5   :  { %15 = vsyncpa [#allocation7 + $0x1], 0  ;;  %s809_s9 = smov 0   ;;  %s811_s10 = smov 0  }
   0x6   :  { %s813_s11 = smov 0   ;;  %s815_s12 = smov 0  }
   0x7   :  { %s817_s13 = smov 0   ;;  %s819_s14 = smov 0  }
   0x8 LB: > { %s551_s15 = sadd.s32 4294967295, %s790_s14   ;;  %s552_s16 = sadd.s32 4294967294, %s790_s14   ;;  %s790_s14 = sphi %s819_s14, %s21_s14   ;;  %s786_s13 = sphi %s817_s13, %s976_s13   ;;  %s782_s12 = sphi %s815_s12, %s975_s12   ;;  %s778_s11 = sphi %s813_s11, %s974_s11   ;;  %s774_s10 = sphi %s811_s10, %s973_s10   ;;  %s770_s9 = sphi %s809_s9, %s972_s9  }
   0x9   : > { %s33_s17 = sadd.s32 1, %s786_s13  ;;  %s42_s18 = sadd.s32 1, %s778_s11 }
   0xa   : > { %p35_p0 = scmp.ge.s32.totalorder %s33_s17, 2  ;;  %p49_p1 = scmp.ne.s32.totalorder %s778_s11, %s774_s10 }
   0xb   : > { %p50_p2 = scmp.eq.s32.totalorder %s790_s14, 0  ;;  %p55_p3 = scmp.ne.s32.totalorder %s774_s10, %s770_s9 }
   0xc   : > { %s978_s17 = smov (%p35_p0, %s33_s17), 0  ;;  %p56_p5 = scmp.eq.s32.totalorder %s551_s15, 0 }
   0xd   : > { %p850_p4 = por %p50_p2, %p49_p1  ;;  %s37_s20 = ssub.s32 %s786_s13, %s978_s17 }
   0xe   : > { %p107_p6 = scmp.eq.s32.totalorder %s551_s15, 1  ;;  %p40_p7 = scmp.eq.s32.totalorder %s37_s20, 0 }
   0xf   : > { %p856_p8 = por %p56_p5, %p55_p3  ;;  %p113_p10 = scmp.eq.s32.totalorder %s552_s16, 1 }
  0x10   : > { %p860_p9 = por %p107_p6, %p49_p1  ;;  %p554_p12 = scmp.ge.s32.totalorder %s790_s14, 2 }
  0x11   : > { %s865_s23 = scalar_select %p40_p7, %s778_s11, %s42_s18  }
  0x12   : > { %p867_p11 = por %p113_p10, %p55_p3  ;;  %p592_p13 = scmp.lt.s32.totalorder %s790_s14, 2 }
  0x13   : > { %s133_s25 = sand.u32 1, %s778_s11   ;;  %s569_s27 = sshll.u32 %s786_s13, 3 }
  0x14   : > { %s555_s26 = sshll.u32 %s133_s25, 3  ;;  %s144_s30 = scalar_lea.hbm %s963_s0, %s569_s27 }
  0x15   : > { %s137_s3 = scalar_lea.vmem [#allocation5], %s555_s26  ;;  %s146_s5 = sshll.u32 %s144_s30, 4  ;;  %s147_s5 = int_to_ptr.hbm [resolvable:$true] %s146_s5 }
  0x16   : > { %s148_s4 = sshll.u32 %s137_s3, 4  ;;  %p582_p0 = pnand %p592_p13, %p850_p4  ;;  %s149_s4 = int_to_ptr.vmem [resolvable:$true] %s148_s4 }
  0x17   : > { %p561_p1 = scmp.ge.s32.totalorder %s790_s14, 1  ;;  %p175_p2 = scmp.lt.s32.totalorder %s790_s14, 3 }
  0x18   : > { %s134_s6 = scalar_lea.sflag [#allocation6], %s133_s25  ;;  %s166_s15 = scalar_lea.hbm %s964_s1, %s569_s27 }
  0x19   : > { %584 = dma.hbm_to_vmem [thread:$0]  (!%p582_p0), %s147_s5, 128, %s149_s4, %s134_s6  }
  0x1a   : > { %p176_p3 = pnand %p561_p1, %p175_p2  ;;  %s159_s16 = scalar_lea.vmem [#allocation8], %s555_s26 }
  0x1b   : > { %s170_s18 = sshll.u32 %s159_s16, 4  ;;  %s168_s20 = sshll.u32 %s166_s15, 4  ;;  %s171_s18 = int_to_ptr.vmem [resolvable:$true] %s170_s18  ;;  %s169_s20 = int_to_ptr.hbm [resolvable:$true] %s168_s20 }
  0x1c   : > { %s156_s28 = scalar_lea.sflag [#allocation9], %s133_s25  ;;  %179 = sbr.rel (%p176_p3) target bundleno = 410 (0x19a), region = 28 }
  0x1d   : > { %587 = dma.hbm_to_vmem [thread:$0]  (!%p582_p0), %s169_s20, 128, %s171_s18, %s156_s28  }
  0x1e   : > { %s886_s19 = sand.u32 (!%p176_p3), 1, %s774_s10  }
  0x1f   : > { %s562_s29 = sshll.u32 (!%p176_p3), %s886_s19, 3  ;;  %s182_s30 = scalar_lea.sflag (!%p176_p3), [#allocation6], %s886_s19 }
  0x20   : > { %s185_s3 = scalar_lea.vmem (!%p176_p3), [#allocation5], %s562_s29 }
  0x21   : > { %757 = dma.done.wait (%p856_p8), %s182_s30, 128  }
  0x22   : > { %759 = vsyncadd (%p856_p8), %s182_s30, 4294967168  ;;  %s192_s26 = scalar_lea.sflag [#allocation9], %s886_s19  ;;  %s195_s25 = scalar_lea.vmem [#allocation8], %s562_s29 }
  0x23   : > { %761 = dma.done.wait (%p856_p8), %s192_s26, 128  }
  0x24   : > { %763 = vsyncadd (%p856_p8), %s192_s26, 4294967168  ;;  %v232_v0 = vld [vmem:[%s185_s3] sm:$0xff]  ;;  %v233_v1 = vld [vmem:[%s195_s25] sm:$0xff]  ;;  %s792_s27 = smov 112   ;;  %v226_v13 = vlaneseq  ;;  %vm242_vm0 = vcmask 1043456   ;;  %v793_v17 = vmov 0.0  }
  0x25   : > { %v234_v2 = vsub.f32 %v232_v0, %v233_v1  ;;  %v258_v3 = vrot.slane %v232_v0, 7  ;;  %vm360_vm2 = vcmask 1040384   ;;  %vm270_vm3 = vcmask 1042432   ;;  %s564_s21 = sshll.u32 %s886_s19, 1  ;;  %s566_s4 = sshll.u32 %s782_s12, 1 }
  0x26   : > { %vm901_vm1 = vcmp.lt.s32.totalorder %v226_v13, 256  ;;  %v297_v45 = vand.u32 127, %v226_v13  ;;  %s439_s7 = scalar_lea.hbm %s965_s2, %s566_s4  ;;  %s221_s8 = scalar_lea.vmem [#allocation10], %s564_s21 }
  0x27   : > { %v235_v4 = vand.u32 2147483647, %v234_v2  ;;  %v260_v5 = vsub.f32 %v232_v0, %v258_v3  ;;  %230 = vst.msk [vmem:[#allocation3] sm:$0x3] %vm901_vm1, %v793_v17  ;;  %s441_s15 = sshll.u32 %s221_s8, 4  ;;  %s443_s18 = sshll.u32 %s439_s7, 4  ;;  %s442_s15 = int_to_ptr.vmem [resolvable:$true] %s441_s15  ;;  %s444_s18 = int_to_ptr.hbm [resolvable:$true] %s443_s18 }
  0x28   : > { %231 = vst.msk [vmem:[#allocation4] sm:$0x3] %vm901_vm1, %v793_v17  ;;  %vm298_vm4 = vcmp.lt.s32.totalorder %v297_v45, 112  ;;  %s429_s12 = scalar_lea.sflag [#allocation7], %s886_s19  ;;  %s718_s28 = sshra.s32 %s444_s18, 4  ;;  %s719_s28 = int_to_ptr.hbm [resolvable:$true] %s718_s28 }
  0x29   : > { %237 = vst [vmem:[#allocation1] ss:$2 sm:$0xff] %v235_v4  ;;  %v261_v6 = vand.u32 2147483647, %v260_v5  ;;  %s720_s29 = scalar_lea.hbm %s719_s28, 2  ;;  %s724_s26 = scalar_lea.hbm %s965_s2, 4 }
  0x2a   : > { %p721_p4 = scmp.ne.s32.totalorder %s719_s28, %s720_s29  ;;  %p725_p7 = scmp.lt.s32.totalorder %s719_s28, %s965_s2 }
  0x2b   : > { %p726_p8 = scmp.lt.s32.totalorder %s724_s26, %s720_s29 }
  0x2c   : > { %p722_p5 = pnand %p721_p4, %p860_p9 }
  0x2d   : > { %p727_p10 = por %p726_p8, %p725_p7 }
  0x2e   : > { %v356_v32 = vld [vmem:[#allocation3] sm:$0x3]  ;;  %p723_p6 = pneg %p722_p5 }
  0x30   : > { %v238_v7 = vld.sshfl [vmem:[#allocation1] sm:$0xff pattern:$0x75316420]  ;;  %v239_v8 = vld.sshfl [vmem:[#allocation1 + $0x8] sm:$0xff pattern:$0x75316420]  ;;  %p728_p13 = pnand %p727_p10, %p723_p6 }
  0x31   : > { %263 = vst [vmem:[#allocation1] ss:$2 sm:$0xff] %v261_v6  ;;  %v250_v14 = vsel %vm242_vm0, %v239_v8, 0.0  ;;  %v243_v19 = vsel %vm242_vm0, %v238_v7, 0.0  ;;  %v324_v8 = vadd.s32 128, %v297_v45 }
  0x32   : > { %v251_v16 = vrot.slane %v250_v14, 4  ;;  %v244_v21 = vrot.slane %v243_v19, 4 }
  0x33   : > { %vm326_vm5 = vcmp.lt.s32.totalorder %v324_v8, 240 }
  0x34   : > { %v252_v18 = vadd.f32 %v251_v16, %v250_v14  ;;  %v245_v23 = vadd.f32 %v244_v21, %v243_v19 }
  0x36   : > { %v253_v20 = vrot.slane %v252_v18, 2  ;;  %v246_v26 = vrot.slane %v245_v23, 2 }
  0x38   : > { %v264_v9 = vld.sshfl [vmem:[#allocation1] sm:$0xff pattern:$0x75316420]  ;;  %v265_v10 = vld.sshfl [vmem:[#allocation1 + $0x8] sm:$0xff pattern:$0x75316420]  ;;  %v254_v22 = vadd.f32 %v253_v20, %v252_v18  ;;  %v247_v28 = vadd.f32 %v246_v26, %v245_v23 }
  0x39   : > { %287 = vst [vmem:[#allocation1] ss:$2 sm:$0xff] %v232_v0  ;;  %v267_v36 = vrot.slane %v265_v10, 1  ;;  %v266_v39 = vrot.slane %v264_v9, 1 }
  0x3a   : > { %v255_v25 = vrot.slane %v254_v22, 1  ;;  %v248_v30 = vrot.slane %v247_v28, 1 }
  0x3b   : > { %v278_v44 = vsel %vm270_vm3, %v267_v36, 0.0  ;;  %v271_v46 = vsel %vm270_vm3, %v266_v39, 0.0 }
  0x3c   : > { %v256_v27 = vadd.f32 %v255_v25, %v254_v22  ;;  %v249_v31 = vadd.f32 %v248_v30, %v247_v28  ;;  %v279_v47 = vrot.slane %v278_v44, 4  ;;  %v272_v48 = vrot.slane %v271_v46, 4 }
  0x3e   : > { %v359_v29 = vrot.slane %v256_v27, 7  ;;  %v280_v50 = vadd.f32 %v279_v47, %v278_v44  ;;  %v273_v54 = vadd.f32 %v272_v48, %v271_v46  ;;  %v422_v46 = vshrl.u32 %v226_v13, 7 }
  0x40   : > { %v288_v11 = vld.sshfl [vmem:[#allocation1] sm:$0xff pattern:$0x75316420]  ;;  %v289_v12 = vld.sshfl [vmem:[#allocation1 + $0x8] sm:$0xff pattern:$0x75316420]  ;;  %v361_v33 = vsel %vm360_vm2, %v249_v31, %v359_v29 }
  0x41   : > { %292 = vrot.lane.b32.xlu0 %v288_v11, %s792_s27  ;;  %301 = vst [vmem:[#allocation1] ss:$2 sm:$0xff] %v232_v0  ;;  %v363_v34 = vadd.f32 %v361_v33, %v356_v32  ;;  %v281_v57 = vrot.slane %v280_v50, 2  ;;  %v274_v60 = vrot.slane %v273_v54, 2  ;;  %vm423_vm6 = vcmp.eq.s32.totalorder %v422_v46, 0 }
  0x43   : > { %368 = vst.msk [vmem:[#allocation3] sm:$0x3] %vm901_vm1, %v363_v34  ;;  %v282_v1 = vadd.f32 %v281_v57, %v280_v50  ;;  %v275_v4 = vadd.f32 %v274_v60, %v273_v54 }
  0x45   : > { %v283_v7 = vrot.slane %v282_v1, 1  ;;  %v276_v11 = vrot.slane %v275_v4, 1 }
  0x47   : > { %v284_v16 = vadd.f32 %v283_v7, %v282_v1  ;;  %v277_v18 = vadd.f32 %v276_v11, %v275_v4 }
  0x48   : > { %v302_v24 = vld.sshfl [vmem:[#allocation1] sm:$0xff pattern:$0x75316420]  ;;  %v303_v49 = vld.sshfl [vmem:[#allocation1 + $0x8] sm:$0xff pattern:$0x75316420] }
  0x49   : > { %294 = vrot.lane.b32.xlu0 %v289_v12, %s792_s27  ;;  %377 = vst [vmem:[#allocation1] sm:$0xff] %v232_v0 }
  0x4a   : > { %v385_v35 = vld [vmem:[#allocation3] sm:$0x3] }
  0x4b   : > { %v387_v37 = vperm.slane %v385_v35, 0  ;;  %v388_v38 = vperm.slane %v385_v35, 1 }
  0x4d   : > { %v391_v40 = vsel %vm360_vm2, %v387_v37, 0.0  ;;  %v392_v41 = vsel %vm360_vm2, %v388_v38, 0.0 }
  0x4e   : > { %v393_v43 = vadd.f32 %v392_v41, %v391_v40 }
  0x50   : > { %394 = vadd.xlane.f32.xlu1 %v393_v43 }
  0xb3   : > { %v293_v42 = vpop.permute.xlu0 %292 }
  0xbb   : > { %v295_v51 = vpop.permute.xlu0 %294 }
  0xbc   : > { %v299_v52 = vsel %vm298_vm4, %v293_v42, %v295_v51  ;;  %v300_v53 = vsel %vm298_vm4, %v295_v51, %v293_v42 }
  0xbd   : > { %v306_v55 = vsub.f32 %v299_v52, %v302_v24  ;;  %v307_v56 = vsub.f32 %v300_v53, %v303_v49  ;;  %v369_v24 = vld [vmem:[#allocation4] sm:$0x3] }
  0xbf   : > { %v308_v58 = vand.u32 2147483647, %v306_v55  ;;  %v309_v59 = vand.u32 2147483647, %v307_v56 }
  0xc1   : > { %v310_v61 = vsel %vm242_vm0, %v308_v58, 0.0  ;;  %v317_v62 = vsel %vm242_vm0, %v309_v59, 0.0 }
  0xc2   : > { %v311_v63 = vrot.slane %v310_v61, 4  ;;  %v318_v0 = vrot.slane %v317_v62, 4 }
  0xc3   : > { %v395_v33 = vpop.xlane.xlu1 %394 }
  0xc4   : > { %v312_v2 = vadd.f32 %v311_v63, %v310_v61  ;;  %v319_v3 = vadd.f32 %v318_v0, %v317_v62  ;;  %v396_v34 = vrot.slane %v395_v33, 4 }
  0xc6   : > { %v313_v5 = vrot.slane %v312_v2, 2  ;;  %v320_v6 = vrot.slane %v319_v3, 2  ;;  %v397_v35 = vadd.f32 %v396_v34, %v395_v33 }
  0xc8   : > { %v314_v9 = vadd.f32 %v313_v5, %v312_v2  ;;  %v321_v10 = vadd.f32 %v320_v6, %v319_v3  ;;  %v398_v36 = vrot.slane %v397_v35, 2 }
  0xca   : > { %v315_v12 = vrot.slane %v314_v9, 1  ;;  %v322_v14 = vrot.slane %v321_v10, 1  ;;  %v399_v37 = vadd.f32 %v398_v36, %v397_v35 }
  0xcc   : > { %v323_v17 = vadd.f32 %v322_v14, %v321_v10  ;;  %v316_v19 = vadd.f32 %v315_v12, %v314_v9  ;;  %v400_v38 = vrot.slane %v399_v37, 1 }
  0xce   : > { %v328_v20 = vsel %vm326_vm5, %v323_v17, 0.0  ;;  %v329_v22 = vadd.f32 %v316_v19, %v277_v18  ;;  %v401_v39 = vadd.f32 %v400_v38, %v399_v37 }
  0xcf   : > { %v330_v21 = vadd.f32 %v328_v20, %v284_v16 }
  0xd0   : > { %571 = vpush %v401_v39 }
  0xd1   : > { %v372_v23 = vrot.slane %v330_v21, 7 }
  0xd3   : > { %v373_v25 = vsel %vm360_vm2, %v329_v22, %v372_v23 }
  0xd4   : > { %v375_v26 = vadd.f32 %v373_v25, %v369_v24 }
  0xd6   : > { %376 = vst.msk [vmem:[#allocation4] sm:$0x3] %vm901_vm1, %v375_v26 }
  0xdd   : > { %v403_v27 = vld [vmem:[#allocation4] sm:$0x3] }
  0xde   : > { %v405_v28 = vperm.slane %v403_v27, 0  ;;  %v406_v29 = vperm.slane %v403_v27, 1 }
  0xe0   : > { %v409_v30 = vsel %vm360_vm2, %v405_v28, 0.0  ;;  %v410_v31 = vsel %vm360_vm2, %v406_v29, 0.0 }
  0xe1   : > { %v411_v32 = vadd.f32 %v410_v31, %v409_v30 }
  0xe3   : > { %412 = vadd.xlane.f32.xlu1 %v411_v32 }
 0x101   : > { %s572_s16 = spop %571 }
 0x102   : > { %v424_v47 = vstv %s572_s16 }
 0x156   : > { %v413_v15 = vpop.xlane.xlu1 %412 }
 0x157   : > { %v414_v40 = vrot.slane %v413_v15, 4 }
 0x159   : > { %v415_v41 = vadd.f32 %v414_v40, %v413_v15 }
 0x15b   : > { %v416_v42 = vrot.slane %v415_v41, 2 }
 0x15d   : > { %v417_v43 = vadd.f32 %v416_v42, %v415_v41 }
 0x15f   : > { %v418_v44 = vrot.slane %v417_v43, 1 }
 0x161   : > { %v419_v45 = vadd.f32 %v418_v44, %v417_v43 }
 0x163   : > { %573 = vpush %v419_v45 }
 0x194   : > { %s574_s20 = spop %573 }
 0x195   : > { %v425_v48 = vstv %s574_s20 }
 0x196   : > { %v426_v49 = vsel %vm423_vm6, %v424_v47, %v425_v48 }
 0x197   : > { %427 = vst [vmem:[%s221_s8] sm:$0x3] %v426_v49 }
 0x198   : > { %731 = shalt.err (!%p728_p13)
}
 0x199   : > { %579 = dma.vmem_to_hbm [thread:$0]  (%p860_p9), %s442_s15, 32, %s444_s18, %s429_s12  }
 0x19a PF: > { %s455_s19 = sand.u32 1, %s770_s9   ;;  %p589_p0 = pnand %p554_p12, %p867_p11 }
 0x19b   : > { %s456_s21 = scalar_lea.sflag [#allocation7], %s455_s19 }
 0x19c   : > { %p590_p1 = pneg %p589_p0 }
 0x19e   : > { %765 = dma.done.wait (%p590_p1), %s456_s21, 32  }
 0x19f   : > { %767 = vsyncadd (%p590_p1), %s456_s21, 4294967264  ;;  %s21_s14 = sadd.s32 1, %s790_s14   ;;  %s972_s9 = smov %s774_s10 }
 0x1a0   : > { %p18_p2 = scmp.ge.s32.totalorder %s21_s14, 4   ;;  %s973_s10 = smov %s778_s11 }
 0x1a1   : > { %s974_s11 = smov %s865_s23  ;;  %s975_s12 = smov %s786_s13 }
 0x1a2   : > { %s976_s13 = smov %s978_s17  ;;  %20 = sbr.rel (!%p18_p2) target bundleno = 8 (0x8), region = 99 }
 0x1a7   :  { %462 = vsyncpa [#allocation6], 1 }
 0x1a8   :  { %464 = vsyncpa [#allocation6 + $0x1], 1 }
 0x1a9   :  { %465 = vsyncpa [#allocation9], 1 }
 0x1aa   :  { %467 = vsyncpa [#allocation9 + $0x1], 1 }
 0x1ab   :  { %468 = vsyncpa [#allocation7], 1 }
 0x1ac   :  { %470 = vsyncpa [#allocation7 + $0x1], 1 }

</bundles_post_ra>
